<compile_context>
chip_gen: v7x
topology: tpu7x:2x2x1
jax: 0.10.0
libtpu: 0.0.40
codegen_flags: <defaults>
</compile_context>

<pallas_src>
import functools

import jax
import jax.numpy as jnp
import numpy as np
from jax import lax
from jax.experimental import pallas as pl
from jax.experimental.pallas import tpu as pltpu


# --------------------------------------------------------------------------- #
# Kernel helpers
# --------------------------------------------------------------------------- #
def _pooling_matrix(n, batch, m, dtype):
    """(n, batch) chunk-sum matrix: P[i, j] = 1.0 iff sample j belongs to chunk i.

    Built in-kernel from broadcasted_iota (no extra DMA).  Values 0/1 are exact
    in every float dtype, so the 1/m mean scaling is folded once into the
    finished Gram instead.
    """
    row = lax.broadcasted_iota(jnp.int32, (n, batch), 0)
    col = lax.broadcasted_iota(jnp.int32, (n, batch), 1)
    off = col - row * m
    in_chunk = (off >= 0) & (off < m)
    return jnp.where(in_chunk, 1.0, 0.0).astype(dtype)


def _finalize(gram, label_num, margin, loss_ref, correct_ref):
    """gram = centers @ centers.T (f32).  Writes scalar loss / correct to SMEM."""
    n = gram.shape[0]
    row = lax.broadcasted_iota(jnp.int32, (n, n), 0)
    col = lax.broadcasted_iota(jnp.int32, (n, n), 1)
    eye = row == col

    # Squared norms from the Gram diagonal; take both a column- and a row-shaped
    # reduction so no (n,1)->(1,n) transpose is needed.
    diag = jnp.where(eye, gram, 0.0)
    sq_col = jnp.sum(diag, axis=1, keepdims=True)          # (n, 1)
    sq_row = jnp.sum(diag, axis=0, keepdims=True)          # (1, n)
    dist2 = jnp.maximum(sq_col + sq_row - 2.0 * gram, 1e-12)

    # Same-class mask from chunk indices: targets = [uniq, uniq], so chunks i, j
    # share a label  <=>  |i - j| in {0, label_num}.
    diff = row - col
    pos = eye | (diff == label_num) | (diff == -label_num)

    BIG = jnp.float32(1e30)
    ap2 = jnp.max(jnp.where(pos, dist2, -BIG), axis=1, keepdims=True)   # (n, 1)
    an2 = jnp.min(jnp.where(pos, BIG, dist2), axis=1, keepdims=True)    # (n, 1)

    # sqrt only the 2n reduced values (monotone sqrt commutes with max/min).
    dist_ap = jnp.sqrt(ap2)
    dist_an = jnp.sqrt(an2)

    # MarginRankingLoss(dist_an, dist_ap, y=1), mean reduction.
    hinge = jnp.maximum(dist_ap - dist_an + jnp.float32(margin), 0.0)
    loss_ref[0] = jnp.sum(hinge) * jnp.float32(1.0 / n)
    correct_ref[0] = jnp.sum((dist_an >= dist_ap).astype(jnp.int32))


# --------------------------------------------------------------------------- #
# Kernels
# --------------------------------------------------------------------------- #
def _fused_kernel(margin, label_num, m, inv_m, precision,
                  feats_ref, loss_ref, correct_ref):
    """Single grid step: whole (batch, D) slab resident; no scratch, no phases."""
    f = feats_ref[...]                                      # (batch, D) native dtype
    batch = f.shape[0]
    n = 2 * label_num

    pool = _pooling_matrix(n, batch, m, f.dtype)            # (n, batch), 0/1
    # Chunk sums on the MXU; widening to f32 happens in the matmul.
    cs = lax.dot_general(pool, f, (((1,), (0,)), ((), ())),
                         preferred_element_type=jnp.float32,
                         precision=precision)               # (n, D) f32
    # Contract the last dim of BOTH operands -> no transpose.
    gram = lax.dot_general(cs, cs, (((1,), (1,)), ((), ())),
                           preferred_element_type=jnp.float32,
                           precision=precision)             # (n, n) f32
    gram = gram * jnp.float32(inv_m * inv_m)                # fold the 1/m mean once
    _finalize(gram, label_num, margin, loss_ref, correct_ref)


def _tiled_kernel(margin, label_num, m, inv_m, precision,
                  feats_ref, loss_ref, correct_ref, gram_ref):
    """Grid axis 0 walks the feature dim D (reduction) for very large batch*D."""
    k = pl.program_id(0)

    @pl.when(k == 0)
    def _init():
        gram_ref[...] = jnp.zeros_like(gram_ref)

    f = feats_ref[...]                                      # (batch, tile_D)
    batch = f.shape[0]
    n = 2 * label_num

    pool = _pooling_matrix(n, batch, m, f.dtype)
    cs = lax.dot_general(pool, f, (((1,), (0,)), ((), ())),
                         preferred_element_type=jnp.float32,
                         precision=precision)               # (n, tile_D) f32
    gram_ref[...] += lax.dot_general(cs, cs, (((1,), (1,)), ((), ())),
                                     preferred_element_type=jnp.float32,
                                     precision=precision)

    @pl.when(k == pl.num_programs(0) - 1)
    def _fin():
        gram = gram_ref[...] * jnp.float32(inv_m * inv_m)
        _finalize(gram, label_num, margin, loss_ref, correct_ref)

    # TODO(synk): on v7x, a leading size-2 "parallel" axis could split the D
    # reduction across the two TensorCores (per-core partial Grams combined at
    # finalize) for very large batch*D.


# --------------------------------------------------------------------------- #
# Wrapper
# --------------------------------------------------------------------------- #
def _tpu_vmem_bytes():
    """Physical per-core VMEM (generation-aware); conservative fallback."""
    try:
        return int(pltpu.get_tpu_info().vmem_capacity_bytes)
    except Exception:
        return 64 << 20            # v7x per-core figure; safe lower bound


def center_triplet_loss(feats, labels=None, num_classes=None, margin=0.3, *,
                        _force_tile_d=None):
    """Pallas implementation of CenterTripletLoss.forward.

    feats : (batch, feat_dim) float (any float dtype; kept native on the DMA).
    labels: (batch,) int -- only its number of unique values matters; pass
            num_classes statically to keep the call fully jittable.
    Returns (loss: f32 scalar, correct: i32 scalar).
    """
    batch, feat_dim = feats.shape
    if num_classes is None:
        if labels is None:
            raise ValueError("pass num_classes (static) or labels")
        # Eager-only fallback: forces a host sync.  Prefer passing num_classes.
        num_classes = int(np.unique(np.asarray(labels)).shape[0])
    num_classes = int(num_classes)
    if num_classes < 2:
        # With one class every pair is "positive" and the reference's per-row
        # negative min is empty; refuse rather than return a silent 0.
        raise ValueError("CenterTripletLoss requires num_classes >= 2")
    n = 2 * num_classes
    if batch % n != 0:
        raise ValueError(f"batch ({batch}) must be divisible by 2*num_classes ({n})")
    m = batch // n

    itemsize = jnp.dtype(feats.dtype).itemsize
    precision = (lax.Precision.HIGHEST
                 if jnp.dtype(feats.dtype) == jnp.float32
                 else lax.Precision.DEFAULT)

    phys = _tpu_vmem_bytes()
    budget = max(8 << 20, phys // 2)          # pipeline working-set target
    gram_bytes = n * n * 4
    full_block_bytes = batch * feat_dim * itemsize

    # ---- choose single-step (fused) vs tiled D reduction -------------------
    if _force_tile_d is not None:             # test hook for the tiled path
        tile_d = int(_force_tile_d)
        if feat_dim % tile_d != 0 or tile_d % 128 != 0:
            raise ValueError("_force_tile_d must be a 128-multiple divisor of D")
        use_fused = False
    else:
        # Default BlockSpec pipelining double-buffers the input; account for it.
        use_fused = (2 * full_block_bytes + gram_bytes + (1 << 20) <= budget
                     or feat_dim % 128 != 0)
        if use_fused:
            tile_d = feat_dim
        else:
            cap_d = max(128, (budget - gram_bytes) // (2 * batch * itemsize))
            cand = min((cap_d // 128) * 128, (feat_dim // 128) * 128)
            tile_d = 128
            while cand >= 128:
                if feat_dim % cand == 0:
                    tile_d = cand
                    break
                cand -= 128
    n_k = feat_dim // tile_d

    block_bytes = batch * tile_d * itemsize
    needed = 2 * block_bytes + gram_bytes + (1 << 20)
    vmem_limit = int(min(max(2 * needed, 32 << 20), phys * 3 // 4))

    cost = pl.CostEstimate(
        flops=int(2 * n * batch * feat_dim + 2 * n * n * feat_dim + 8 * n * n),
        transcendentals=int(2 * n),
        bytes_accessed=int(batch * feat_dim * itemsize + gram_bytes + 8),
    )
    compiler_params = pltpu.CompilerParams(
        dimension_semantics=("arbitrary",),
        vmem_limit_bytes=vmem_limit,
    )
    out_shape = (jax.ShapeDtypeStruct((1,), jnp.float32),
                 jax.ShapeDtypeStruct((1,), jnp.int32))
    out_specs = (pl.BlockSpec(memory_space=pltpu.MemorySpace.SMEM),
                 pl.BlockSpec(memory_space=pltpu.MemorySpace.SMEM))

    if use_fused:
        kernel = functools.partial(_fused_kernel, float(margin), num_classes,
                                   m, 1.0 / m, precision)
        grid_spec = pltpu.PrefetchScalarGridSpec(
            num_scalar_prefetch=0,
            grid=(1,),
            in_specs=[pl.BlockSpec((batch, feat_dim), lambda k: (0, 0))],
            out_specs=out_specs,
            scratch_shapes=[],
        )
    else:
        kernel = functools.partial(_tiled_kernel, float(margin), num_classes,
                                   m, 1.0 / m, precision)
        grid_spec = pltpu.PrefetchScalarGridSpec(
            num_scalar_prefetch=0,
            grid=(n_k,),
            in_specs=[pl.BlockSpec((batch, tile_d), lambda k: (0, k))],
            out_specs=out_specs,
            scratch_shapes=[pltpu.VMEM((n, n), jnp.float32)],
        )

    loss, correct = pl.pallas_call(
        kernel,
        out_shape=out_shape,
        grid_spec=grid_spec,
        compiler_params=compiler_params,
        cost_estimate=cost,
    )(feats)
    return loss[0], correct[0]


# --------------------------------------------------------------------------- #
# NumPy reference (mirrors the PyTorch module)
# --------------------------------------------------------------------------- #
def _reference_numpy(feats, labels, margin=0.3):
    feats = np.asarray(feats, np.float32)
    labels = np.asarray(labels)
    uniq = np.unique(labels)
    targets = np.concatenate([uniq, uniq])
    n = len(targets)
    m = feats.shape[0] // n
    centers = np.stack([feats[i * m:(i + 1) * m].mean(0) for i in range(n)])
    sq = (centers ** 2).sum(1, keepdims=True)
    dist = np.sqrt(np.clip(sq + sq.T - 2.0 * centers @ centers.T, 1e-12, None))
    mask = targets[:, None] == targets[None, :]
    ap = np.array([dist[i][mask[i]].max() for i in range(n)])
    an = np.array([dist[i][~mask[i]].min() for i in range(n)])
    loss = np.maximum(ap - an + margin, 0.0).mean()
    correct = int((an >= ap).sum())
    return loss, correct


if __name__ == "__main__":
    num_classes = 4           # label_num (fixed by the sampler)
    per_chunk = 2             # samples per (class, modality) chunk
    n = 2 * num_classes
    batch = n * per_chunk     # 16

    # labels arranged the way the module expects: chunk i carries targets[i].
    classes = jnp.arange(num_classes, dtype=jnp.int32)
    labels = jnp.concatenate([jnp.repeat(classes, per_chunk),
                              jnp.repeat(classes, per_chunk)])       # (16,)

    # --- single-pass (fused) path: whole feature dim in one grid step -------
    feat_dim = 64
    feats = jax.random.normal(jax.random.PRNGKey(0), (batch, feat_dim),
                              dtype=jnp.float32)
    fn = jax.jit(functools.partial(center_triplet_loss,
                                   num_classes=num_classes, margin=0.3))
    loss, correct = fn(feats, labels)
    loss = jax.block_until_ready(loss)
    correct = jax.block_until_ready(correct)
    ref_loss, ref_correct = _reference_numpy(feats, labels, margin=0.3)
    assert np.allclose(float(loss), ref_loss, rtol=1e-3, atol=1e-4), \
        (float(loss), ref_loss)
    assert int(correct) == ref_correct, (int(correct), ref_correct)

    # --- tiled D-reduction path (forced, validates the large-input code) ----
    feat_dim2 = 256
    feats2 = jax.random.normal(jax.random.PRNGKey(1), (batch, feat_dim2),
                               dtype=jnp.float32)
    fn2 = jax.jit(functools.partial(center_triplet_loss,
                                    num_classes=num_classes, margin=0.3,
                                    _force_tile_d=128))
    loss2, correct2 = fn2(feats2, labels)
    loss2 = jax.block_until_ready(loss2)
    correct2 = jax.block_until_ready(correct2)
    ref_loss2, ref_correct2 = _reference_numpy(feats2, labels, margin=0.3)
    assert np.allclose(float(loss2), ref_loss2, rtol=1e-3, atol=1e-4), \
        (float(loss2), ref_loss2)
    assert int(correct2) == ref_correct2, (int(correct2), ref_correct2)

    print("KERNEL_OK")
</pallas_src>

<mosaic_0001>
module attributes {stable_mosaic.version = 11 : i64} {
  func.func @_fused_kernel(%arg0: i32, %arg1: memref<16x64xf32, #tpu.memory_space<vmem>>, %arg2: memref<1xf32, #tpu.memory_space<smem>>, %arg3: memref<1xi32, #tpu.memory_space<smem>>) attributes {dimension_semantics = [#tpu.dimension_semantics<arbitrary>], iteration_bounds = array<i64: 1>, scalar_prefetch = 0 : i64, scratch_operands = 0 : i64, tpu.core_type = #tpu.core_type<tc>, window_params = [{pipeline_mode = #tpu.pipeline_mode<synchronous>, transform_indices = @transform_0, window_bounds = array<i64: 16, 64>}, {transform_indices = @transform_1, window_bounds = array<i64: 1>}, {transform_indices = @transform_2, window_bounds = array<i64: 1>}]} {
    %c0 = arith.constant 0 : index
    %c0_0 = arith.constant 0 : index
    %0 = vector.load %arg1[%c0, %c0_0] : memref<16x64xf32, #tpu.memory_space<vmem>>, vector<16x64xf32>
    %1 = tpu.iota {dimensions = array<i32: 0>} : vector<8x16xi32>
    %2 = tpu.iota {dimensions = array<i32: 1>} : vector<8x16xi32>
    %c2_i32 = arith.constant 2 : i32
    %3 = vector.broadcast %c2_i32 : i32 to vector<8x16xi32>
    %4 = arith.muli %1, %3 : vector<8x16xi32>
    %5 = arith.subi %2, %4 : vector<8x16xi32>
    %c0_i32 = arith.constant 0 : i32
    %6 = vector.broadcast %c0_i32 : i32 to vector<8x16xi32>
    %7 = arith.cmpi sge, %5, %6 : vector<8x16xi32>
    %c2_i32_1 = arith.constant 2 : i32
    %8 = vector.broadcast %c2_i32_1 : i32 to vector<8x16xi32>
    %9 = arith.cmpi slt, %5, %8 : vector<8x16xi32>
    %10 = arith.andi %7, %9 : vector<8x16xi1>
    %cst = arith.constant 1.000000e+00 : f32
    %cst_2 = arith.constant 0.000000e+00 : f32
    %11 = vector.broadcast %cst : f32 to vector<8x16xf32>
    %12 = vector.broadcast %cst_2 : f32 to vector<8x16xf32>
    %13 = arith.select %10, %11, %12 : vector<8x16xi1>, vector<8x16xf32>
    %cst_3 = arith.constant dense<0.000000e+00> : vector<8x64xf32>
    %14 = tpu.matmul %13, %0, %cst_3 {dimension_numbers = #tpu.dot_dimension_numbers<[1], [0], [0], [1], [0, 0, 1, 1], [], []>, precision = #tpu.contract_precision<fp32>} : vector<8x16xf32>, vector<16x64xf32>, vector<8x64xf32> -> vector<8x64xf32>
    %cst_4 = arith.constant dense<0.000000e+00> : vector<8x8xf32>
    %15 = tpu.matmul %14, %14, %cst_4 {dimension_numbers = #tpu.dot_dimension_numbers<[1], [1], [0], [0], [0, 0, 1, 0], [], []>, precision = #tpu.contract_precision<fp32>} : vector<8x64xf32>, vector<8x64xf32>, vector<8x8xf32> -> vector<8x8xf32>
    %cst_5 = arith.constant 2.500000e-01 : f32
    %16 = vector.broadcast %cst_5 : f32 to vector<8x8xf32>
    %17 = arith.mulf %15, %16 : vector<8x8xf32>
    %18 = tpu.iota {dimensions = array<i32: 0>} : vector<8x8xi32>
    %19 = tpu.iota {dimensions = array<i32: 1>} : vector<8x8xi32>
    %20 = arith.cmpi eq, %18, %19 : vector<8x8xi32>
    %cst_6 = arith.constant 0.000000e+00 : f32
    %21 = vector.broadcast %cst_6 : f32 to vector<8x8xf32>
    %22 = arith.select %20, %17, %21 : vector<8x8xi1>, vector<8x8xf32>
    %cst_7 = arith.constant dense<0.000000e+00> : vector<8xf32>
    %23 = vector.multi_reduction <add>, %22, %cst_7 [1] : vector<8x8xf32> to vector<8xf32>
    %24 = vector.shape_cast %23 : vector<8xf32> to vector<8x1xf32>
    %cst_8 = arith.constant dense<0.000000e+00> : vector<8xf32>
    %25 = vector.multi_reduction <add>, %22, %cst_8 [0] : vector<8x8xf32> to vector<8xf32>
    %26 = vector.shape_cast %25 : vector<8xf32> to vector<1x8xf32>
    %27 = vector.broadcast %24 : vector<8x1xf32> to vector<8x8xf32>
    %28 = vector.broadcast %26 : vector<1x8xf32> to vector<8x8xf32>
    %29 = arith.addf %27, %28 : vector<8x8xf32>
    %cst_9 = arith.constant 2.000000e+00 : f32
    %30 = vector.broadcast %cst_9 : f32 to vector<8x8xf32>
    %31 = arith.mulf %30, %17 : vector<8x8xf32>
    %32 = arith.subf %29, %31 : vector<8x8xf32>
    %cst_10 = arith.constant 9.99999996E-13 : f32
    %33 = vector.broadcast %cst_10 : f32 to vector<8x8xf32>
    %34 = arith.maximumf %32, %33 : vector<8x8xf32>
    %35 = arith.subi %18, %19 : vector<8x8xi32>
    %c4_i32 = arith.constant 4 : i32
    %36 = vector.broadcast %c4_i32 : i32 to vector<8x8xi32>
    %37 = arith.cmpi eq, %35, %36 : vector<8x8xi32>
    %38 = arith.ori %20, %37 : vector<8x8xi1>
    %c-4_i32 = arith.constant -4 : i32
    %39 = vector.broadcast %c-4_i32 : i32 to vector<8x8xi32>
    %40 = arith.cmpi eq, %35, %39 : vector<8x8xi32>
    %41 = arith.ori %38, %40 : vector<8x8xi1>
    %cst_11 = arith.constant 0.000000e+00 : f32
    %cst_12 = arith.constant 1.000000e+30 : f32
    %42 = arith.subf %cst_11, %cst_12 : f32
    %43 = vector.broadcast %42 : f32 to vector<8x8xf32>
    %44 = arith.select %41, %34, %43 : vector<8x8xi1>, vector<8x8xf32>
    %cst_13 = arith.constant dense<0xFF800000> : vector<8xf32>
    %45 = vector.multi_reduction <maximumf>, %44, %cst_13 [1] : vector<8x8xf32> to vector<8xf32>
    %46 = vector.shape_cast %45 : vector<8xf32> to vector<8x1xf32>
    %cst_14 = arith.constant 1.000000e+30 : f32
    %47 = vector.broadcast %cst_14 : f32 to vector<8x8xf32>
    %48 = arith.select %41, %47, %34 : vector<8x8xi1>, vector<8x8xf32>
    %cst_15 = arith.constant dense<0x7F800000> : vector<8xf32>
    %49 = vector.multi_reduction <minimumf>, %48, %cst_15 [1] : vector<8x8xf32> to vector<8xf32>
    %50 = vector.shape_cast %49 : vector<8xf32> to vector<8x1xf32>
    %51 = math.sqrt %46 : vector<8x1xf32>
    %52 = math.sqrt %50 : vector<8x1xf32>
    %53 = arith.subf %51, %52 : vector<8x1xf32>
    %cst_16 = arith.constant 3.000000e-01 : f32
    %54 = vector.broadcast %cst_16 : f32 to vector<8x1xf32>
    %55 = arith.addf %53, %54 : vector<8x1xf32>
    %cst_17 = arith.constant 0.000000e+00 : f32
    %56 = vector.broadcast %cst_17 : f32 to vector<8x1xf32>
    %57 = arith.maximumf %55, %56 : vector<8x1xf32>
    %58 = vector.shape_cast %57 : vector<8x1xf32> to vector<1x8x1xf32>
    %cst_18 = arith.constant dense<0.000000e+00> : vector<1xf32>
    %59 = vector.multi_reduction <add>, %58, %cst_18 [1, 2] : vector<1x8x1xf32> to vector<1xf32>
    %60 = vector.shape_cast %59 : vector<1xf32> to vector<1x1x1xf32>
    %61 = vector.extract %60[0, 0, 0] : f32 from vector<1x1x1xf32>
    %cst_19 = arith.constant 1.250000e-01 : f32
    %62 = arith.mulf %61, %cst_19 : f32
    %c0_20 = arith.constant 0 : index
    %63 = memref.load %arg2[%c0_20] : memref<1xf32, #tpu.memory_space<smem>>
    memref.store %62, %arg2[%c0_20] : memref<1xf32, #tpu.memory_space<smem>>
    %64 = arith.cmpf oge, %52, %51 : vector<8x1xf32>
    %65 = arith.extui %64 : vector<8x1xi1> to vector<8x1xi32>
    %66 = vector.shape_cast %65 : vector<8x1xi32> to vector<1x8x1xi32>
    %cst_21 = arith.constant dense<0> : vector<1xi32>
    %67 = vector.multi_reduction <add>, %66, %cst_21 [1, 2] : vector<1x8x1xi32> to vector<1xi32>
    %68 = vector.shape_cast %67 : vector<1xi32> to vector<1x1x1xi32>
    %69 = vector.extract %68[0, 0, 0] : i32 from vector<1x1x1xi32>
    %c0_22 = arith.constant 0 : index
    %70 = memref.load %arg3[%c0_22] : memref<1xi32, #tpu.memory_space<smem>>
    memref.store %69, %arg3[%c0_22] : memref<1xi32, #tpu.memory_space<smem>>
    return
  }
  func.func @transform_0(%arg0: i32) -> (i32, i32) {
    %c0_i32 = arith.constant 0 : i32
    %c0_i32_0 = arith.constant 0 : i32
    %c0_i32_1 = arith.constant 0 : i32
    return %c0_i32, %c0_i32_0 : i32, i32
  }
  func.func @transform_1(%arg0: i32) -> i32 {
    %c0_i32 = arith.constant 0 : i32
    %c0_i32_0 = arith.constant 0 : i32
    return %c0_i32 : i32
  }
  func.func @transform_2(%arg0: i32) -> i32 {
    %c0_i32 = arith.constant 0 : i32
    %c0_i32_0 = arith.constant 0 : i32
    return %c0_i32 : i32
  }
}

</mosaic_0001>

<bundles_post_ra>
// kernel: center_triplet_loss.1
= control target key start
LH: loop header
LB: loop body
LE: loop exit
PB: predicated region body
PF: predicated region fallthrough
CT: control target
= control target key end

     0   :  { %8 = vsyncpa [#allocation3], 0  ;;  %s1371_s0 = inlined_call_operand.hbm [shape: f32[16,64], index: 0, kind: input, shape index: {}]   ;;  %s1372_s1 = inlined_call_operand.hbm [shape: f32[1], index: 1, kind: output, shape index: {0}]   ;;  %s1373_s2 = inlined_call_operand.hbm [shape: s32[1], index: 2, kind: output, shape index: {1}]  }
   0x1   :  { %9 = vsyncpa [#allocation4], 0 }
   0x2   :  { %10 = vsyncpa [#allocation7], 0  ;;  %s1257_s9 = smov [#allocation2]   ;;  %s1209_s13 = scalar_lea.hbm %s1371_s0, 256 }
   0x3   :  { %s16_s10 = sshll.u32 %s1257_s9, 4  ;;  %p1210_p0 = scmp.ne.s32.totalorder %s1371_s0, %s1209_s13  ;;  %s17_s10 = int_to_ptr.vmem [resolvable:$true] %s16_s10 }
   0x4   :  { %p1213_p1 = scmp.lt.u32.totalorder %s1209_s13, %s1371_s0 }
   0x6   :  { %p1215_p2 = pnand %p1213_p1, %p1210_p0 }
   0x8   :  { %1218 = shalt.err (!%p1215_p2)
}
   0x9   :  { %s1219_s18 = scalar_lea.vmem %s17_s10, 256  ;;  %p1224_p4 = scmp.lt.s32.totalorder %s17_s10, %s17_s10 }
   0xa   :  { %p1220_p3 = scmp.ne.s32.totalorder %s17_s10, %s1219_s18  ;;  %p1225_p5 = scmp.lt.s32.totalorder %s1219_s18, %s1219_s18 }
   0xc   :  { %p1226_p6 = por %p1225_p5, %p1224_p4 }
   0xe   :  { %p1227_p7 = pnand %p1226_p6, %p1220_p3 }
  0x10   :  { %1230 = shalt.err (!%p1227_p7)
}
  0x11   :  { %s1258_s19 = smov 128   ;;  %s1259_s20 = smov 8  }
  0x12   :  { %22 = dma.hbm_to_vmem [thread:$0]  %s1371_s0, 256, %s17_s10, [#allocation3], %s1258_s19, %s1258_s19, %s1259_s20  }
  0x13   :  { %1251 = dma.done.wait [#allocation3], 256  }
  0x14   :  { %1252 = vsyncadd [#allocation3], 4294967040  ;;  %v28_v0 = vlaneseq  ;;  %v1260_v1 = vmov 0.0|0.0   ;;  %vm1261_vm0 = vmmov 0   ;;  %v1262_v2 = vmov 0.0   ;;  %v26_v7 = vld [vmem:[#allocation2] sm:$0xff] }
  0x15   :  { %1154 = vmatprep.subr.bf16.mxu0 %v1260_v1  ;;  %1086 = vmatprep.mubr.msk.f32.mxu0 %vm1261_vm0, %v1262_v2  ;;  %v27_v8 = vld [vmem:[#allocation2 + $0x8] sm:$0xff]  ;;  %vm38_vm1 = vcmask 130048   ;;  %v43_v9 = vand.u32 4294901760, %v26_v7  ;;  %vm501_vm5 = vcmask 523264   ;;  %vm954_vm7 = vcmask 64512   ;;  %s1231_s27 = scalar_lea.hbm %s1372_s1, 16 }
  0x16   :  { %v1295_v3 = vshrl.u32 %v28_v0, 7  ;;  %v1297_v4 = vand.u32 127, %v28_v0  ;;  %1124 = vmatprep.subr.mxu1 %v1262_v2  ;;  %1126 = vmatprep.mubr.msk.f32.mxu1 %vm1261_vm0, %v1262_v2  ;;  %v46_v10 = vand.u32 4294901760, %v27_v8  ;;  %p1232_p8 = scmp.ne.s32.totalorder %s1372_s1, %s1231_s27  ;;  %p1235_p9 = scmp.lt.u32.totalorder %s1231_s27, %s1372_s1 }
  0x17   :  { %v121_v12 = vsub.f32 %v26_v7, %v43_v9 }
  0x18   :  { %v32_v5 = vmul.u32 2, %v1295_v3  ;;  %v1155_v11 = vpack.c.bf16 %v46_v10, %v43_v9  ;;  %v128_v13 = vsub.f32 %v27_v8, %v46_v10  ;;  %vm952_vm6 = vcmp.eq.s32.totalorder %v1295_v3, %v1297_v4  ;;  %p1237_p10 = pnand %p1235_p9, %p1232_p8 }
  0x19   :  { %v122_v17 = vand.u32 4294901760, %v121_v12  ;;  %v968_v46 = vsub.s32 %v1295_v3, %v1297_v4  ;;  %v1263_v10 = vmov 0  }
  0x1a   :  { %v33_v6 = vsub.s32 %v1297_v4, %v32_v5  ;;  %1156 = vmatpush3.bf16.msra.mxu0 %v1155_v11  ;;  %v129_v18 = vand.u32 4294901760, %v128_v13  ;;  %v1161_v27 = vpack.c.bf16 %v128_v13, %v121_v12 }
  0x1b   :  { %1157 = vmatprep.subr.bf16.mxu0 %v1260_v1  ;;  %v123_v20 = vsub.f32 %v121_v12, %v122_v17  ;;  %vm969_vm8 = vcmp.eq.s32.totalorder %v968_v46, 4  ;;  %vm971_vm10 = vcmp.eq.s32.totalorder %v968_v46, 4294967292 }
  0x1c   :  { %vm34_vm2 = vcmp.ge.s32.totalorder %v33_v6, 0  ;;  %vm35_vm3 = vcmp.lt.s32.totalorder %v33_v6, 2  ;;  %v130_v21 = vsub.f32 %v128_v13, %v129_v18  ;;  %v1167_v28 = vpack.c.bf16 %v129_v18, %v122_v17  ;;  %vm970_vm9 = vmor %vm952_vm6, %vm969_vm8 }
  0x1d   :  { %vm36_vm4 = vmand %vm34_vm2, %vm35_vm3  ;;  %v124_v23 = vand.u32 4294901760, %v123_v20 }
  0x1e   :  { %v37_v14 = vsel %vm36_vm4, 1.0, %v1262_v2  ;;  %v131_v24 = vand.u32 4294901760, %v130_v21  ;;  %vm972_vm11 = vmor %vm970_vm9, %vm971_vm10 }
  0x1f   :  { %v40_v15 = vsel %vm38_vm1, %v37_v14, 0 }
  0x20   :  { %v110_v16 = vsub.f32 %v40_v15, %v40_v15  ;;  %v1158_v26 = vpack.c.bf16 %v131_v24, %v124_v23 }
  0x22   :  { %v111_v19 = vand.u32 4294901760, %v110_v16 }
  0x24   :  { %v112_v22 = vsub.f32 %v110_v16, %v111_v19 }
  0x26   :  { %v113_v25 = vand.u32 4294901760, %v112_v22 }
  0x28   :  { %1087 = vmatmul.mubr.f32.vlgmr.msra.gmra.mrb[0].mxu0 %v113_v25 }
  0x29   :  { %1159 = vmatpush3.bf16.msra.mxu0 %v1158_v26  ;;  %1093 = vmatprep.mubr.msk.f32.mxu0 %vm1261_vm0, %v1262_v2 }
  0x2a   :  { %1160 = vmatprep.subr.bf16.mxu0 %v1260_v1 }
  0x30   :  { %1094 = vmatmul.mubr.msk.f32.vlgmr.msra.gmra.mrb[0].mxu0 %vm38_vm1, %v37_v14 }
  0x31   :  { %1162 = vmatpush3.bf16.msra.mxu0 %v1161_v27  ;;  %1100 = vmatprep.mubr.msk.f32.mxu0 %vm1261_vm0, %v1262_v2 }
  0x32   :  { %1163 = vmatprep.subr.bf16.mxu0 %v1260_v1 }
  0x38   :  { %1101 = vmatmul.mubr.f32.vlgmr.msra.gmra.mrb[0].mxu0 %v110_v16 }
  0x39   :  { %1165 = vmatpush3.bf16.msra.mxu0 %v1155_v11  ;;  %1107 = vmatprep.mubr.msk.f32.mxu0 %vm1261_vm0, %v1262_v2 }
  0x3a   :  { %1166 = vmatprep.subr.bf16.mxu0 %v1260_v1 }
  0x40   :  { %1108 = vmatmul.mubr.f32.vlgmr.msra.gmra.mrb[0].mxu0 %v111_v19 }
  0x41   :  { %1168 = vmatpush3.bf16.msra.mxu0 %v1167_v28  ;;  %1114 = vmatprep.mubr.msk.f32.mxu0 %vm1261_vm0, %v1262_v2 }
  0x42   :  { %1169 = vmatprep.subr.bf16.mxu0 %v1260_v1 }
  0x48   :  { %1115 = vmatmul.mubr.msk.f32.vlgmr.msra.gmra.mrb[0].mxu0 %vm38_vm1, %v37_v14 }
  0x49   :  { %1171 = vmatpush3.bf16.msra.mxu0 %v1155_v11  ;;  %1121 = vmatprep.mubr.msk.f32.mxu0 %vm1261_vm0, %v1262_v2 }
  0x50   :  { %1122 = vmatmul.mubr.msk.f32.vlgmr.msra.gmra.mrb[0].mxu0 %vm38_vm1, %v37_v14  ;;  %vm998_vm1 = vcmask 7168  }
 0x123   :  { %v497_v29 = vpop.f32.mrb[0].mxu0 }
 0x124   :  { %v503_v30 = vsel %vm501_vm5, %v497_v29, 0  ;;  %v1123_v31 = vpop.f32.mrb[1].mxu0 }
 0x125   :  { %v506_v32 = vand.u32 4294901760, %v503_v30 }
 0x127   :  { %v572_v33 = vsub.f32 %v503_v30, %v506_v32  ;;  %1125 = vmatpush3.xpose.msra.mxu1 %v506_v32 }
 0x128   :  { %1129 = vmatprep.subr.mxu1 %v1262_v2 }
 0x129   :  { %v573_v34 = vand.u32 4294901760, %v572_v33 }
 0x12b   :  { %v574_v35 = vsub.f32 %v572_v33, %v573_v34 }
 0x12d   :  { %v575_v36 = vand.u32 4294901760, %v574_v35 }
 0x12f   :  { %1127 = vmatmul.mubr.f32.vlgmr.msra.gmra.mrb[0].mxu1 %v575_v36 }
 0x130   :  { %1130 = vmatpush3.xpose.msra.mxu1 %v575_v36  ;;  %1131 = vmatprep.mubr.msk.f32.mxu1 %vm1261_vm0, %v1262_v2 }
 0x131   :  { %1134 = vmatprep.subr.mxu1 %v1262_v2 }
 0x137   :  { %1132 = vmatmul.mubr.f32.vlgmr.msra.gmra.mrb[0].mxu1 %v506_v32 }
 0x138   :  { %1135 = vmatpush3.xpose.msra.mxu1 %v572_v33  ;;  %1136 = vmatprep.mubr.msk.f32.mxu1 %vm1261_vm0, %v1262_v2 }
 0x139   :  { %1139 = vmatprep.subr.mxu1 %v1262_v2 }
 0x13f   :  { %1137 = vmatmul.mubr.f32.vlgmr.msra.gmra.mrb[0].mxu1 %v572_v33 }
 0x140   :  { %1140 = vmatpush3.xpose.msra.mxu1 %v506_v32  ;;  %1141 = vmatprep.mubr.msk.f32.mxu1 %vm1261_vm0, %v1262_v2 }
 0x141   :  { %1144 = vmatprep.subr.mxu1 %v1262_v2 }
 0x147   :  { %1142 = vmatmul.mubr.f32.vlgmr.msra.gmra.mrb[0].mxu1 %v573_v34 }
 0x148   :  { %1145 = vmatpush3.xpose.msra.mxu1 %v573_v34  ;;  %1146 = vmatprep.mubr.msk.f32.mxu1 %vm1261_vm0, %v1262_v2 }
 0x149   :  { %1149 = vmatprep.subr.mxu1 %v1262_v2 }
 0x14f   :  { %1147 = vmatmul.mubr.f32.vlgmr.msra.gmra.mrb[0].mxu1 %v506_v32 }
 0x150   :  { %1150 = vmatpush3.xpose.msra.mxu1 %v506_v32  ;;  %1151 = vmatprep.mubr.msk.f32.mxu1 %vm1261_vm0, %v1262_v2 }
 0x157   :  { %1152 = vmatmul.mubr.f32.vlgmr.msra.gmra.mrb[0].mxu1 %v506_v32 }
 0x22a   :  { %v947_v37 = vpop.f32.mrb[0].mxu1 }
 0x22b   :  { %v951_v38 = vmul.f32 0.25, %v947_v37  ;;  %v1153_v39 = vpop.f32.mrb[1].mxu1 }
 0x22d   :  { %v953_v40 = vsel %vm952_vm6, %v951_v38, 0.0  ;;  %v965_v50 = vmul.f32 2.0, %v951_v38 }
 0x22e   :  { %v955_v41 = vsel %vm954_vm7, %v953_v40, 0.0 }
 0x22f   :  { %956 = vadd.xlane.f32.xlu0 %v955_v41  ;;  %v958_v42 = vrot.slane %v955_v41, 4 }
 0x231   :  { %v959_v43 = vadd.f32 %v958_v42, %v955_v41 }
 0x233   :  { %v960_v44 = vrot.slane %v959_v43, 2 }
 0x235   :  { %v961_v45 = vadd.f32 %v960_v44, %v959_v43 }
 0x237   :  { %v962_v47 = vrot.slane %v961_v45, 1 }
 0x239   :  { %v963_v48 = vadd.f32 %v962_v47, %v961_v45 }
 0x2bc   :  { %v957_v49 = vpop.xlane.xlu0 %956 }
 0x2bd   :  { %v964_v51 = vadd.f32 %v963_v48, %v957_v49 }
 0x2bf   :  { %v966_v52 = vsub.f32 %v964_v51, %v965_v50 }
 0x2c1   :  { %v967_v53 = vmax.f32 %v966_v52, 1e-12 }
 0x2c3   :  { %v977_v54 = vsel %vm972_vm11, 1e+30, %v967_v53  ;;  %v973_v55 = vsel %vm972_vm11, %v967_v53, -1e+30 }
 0x2c4   :  { %v978_v56 = vsel %vm954_vm7, %v977_v54, inf  ;;  %v974_v57 = vsel %vm954_vm7, %v973_v55, -inf }
 0x2c5   :  { %979 = vmin.xlane.f32.xlu1 %v978_v56  ;;  %975 = vmax.xlane.f32.xlu0 %v974_v57 }
 0x352   :  { %v980_v58 = vpop.xlane.xlu1 %979  ;;  %v976_v59 = vpop.xlane.xlu0 %975 }
 0x353   :  { %1205 = vrsqrt.f32 %v980_v58  ;;  %vm990_vm12 = vcmp.eq.f32.partialorder %v980_v58, inf  ;;  %v993_v0 = vand.u32 2147483648, %v980_v58  ;;  %vm983_vm13 = vcmp.eq.f32.partialorder %v976_v59, inf }
 0x354   :  { %1207 = vrsqrt.f32 %v976_v59  ;;  %v986_v1 = vand.u32 2147483648, %v976_v59  ;;  %vm992_vm14 = vcmp.eq.f32.partialorder %v980_v58, 0.0  ;;  %vm985_vm15 = vcmp.eq.f32.partialorder %v976_v59, 0.0 }
 0x35d   :  { %v1206_v60 = vpop.eup %1205 }
 0x35e   :  { %v1208_v61 = vpop.eup %1207  ;;  %v989_v62 = vmul.f32 %v1206_v60, %v980_v58 }
 0x35f   :  { %v982_v63 = vmul.f32 %v1208_v61, %v976_v59 }
 0x360   :  { %v991_v2 = vsel %vm990_vm12, %v980_v58, %v989_v62 }
 0x361   :  { %v984_v3 = vsel %vm983_vm13, %v976_v59, %v982_v63  ;;  %v994_v4 = vsel %vm992_vm14, %v993_v0, %v991_v2 }
 0x362   :  { %v987_v5 = vsel %vm985_vm15, %v986_v1, %v984_v3 }
 0x363   :  { %v995_v6 = vsub.f32 %v987_v5, %v994_v4  ;;  %vm1012_vm0 = vcmp.ge.f32.partialorder %v994_v4, %v987_v5 }
 0x364   :  { %v1013_v11 = vsel %vm1012_vm0, 1, %v1263_v10 }
 0x365   :  { %v996_v7 = vadd.f32 0.3, %v995_v6  ;;  %v1014_v12 = vrot.slane %v1013_v11, 4 }
 0x367   :  { %v997_v8 = vmax.f32 %v996_v7, 0.0  ;;  %v1015_v13 = vadd.s32 %v1014_v12, %v1013_v11 }
 0x369   :  { %v999_v9 = vsel %vm998_vm1, %v997_v8, 0.0  ;;  %v1016_v15 = vrot.slane %v1015_v13, 2 }
 0x36a   :  { %1000 = vadd.xlane.f32.xlu1 %v999_v9 }
 0x36b   :  { %v1017_v18 = vadd.s32 %v1016_v15, %v1015_v13 }
 0x36d   :  { %v1018_v21 = vrot.slane %v1017_v18, 1 }
 0x36f   :  { %v1019_v24 = vadd.s32 %v1018_v21, %v1017_v18 }
 0x3f7   :  { %v1001_v14 = vpop.xlane.xlu1 %1000 }
 0x3f8   :  { %v1002_v16 = vrot.slane %v1001_v14, 4 }
 0x3fa   :  { %v1003_v17 = vadd.f32 %v1002_v16, %v1001_v14 }
 0x3fc   :  { %v1004_v19 = vrot.slane %v1003_v17, 2 }
 0x3fe   :  { %v1005_v20 = vadd.f32 %v1004_v19, %v1003_v17 }
 0x400   :  { %v1006_v22 = vrot.slane %v1005_v20, 1 }
 0x402   :  { %v1007_v23 = vadd.f32 %v1006_v22, %v1005_v20 }
 0x404   :  { %1192 = vpush %v1007_v23 }
 0x405   :  { %1194 = vpush %v1019_v24 }
 0x435   :  { %s1193_s0 = spop %1192 }
 0x436   :  { %s1009_s23 = smul.f32 0.125, %s1193_s0  ;;  %s1195_s24 = spop %1194 }
 0x437   :  { %1022 = sst [smem:[#allocation6]] %s1195_s24 }
 0x438   :  { %1011 = sst [smem:[#allocation5]] %s1009_s23 }
 0x439   :  { %1240 = shalt.err (!%p1237_p10)
}
 0x43a   :  { %s1264_s4 = smov [#allocation5]   ;;  %s1241_s9 = scalar_lea.hbm %s1373_s2, 16 }
 0x43b   :  { %1030 = dma.smem_to_hbm %s1264_s4, 16, %s1372_s1, [#allocation4]  }
 0x43c   :  { %p1242_p11 = scmp.ne.s32.totalorder %s1373_s2, %s1241_s9  ;;  %p1245_p12 = scmp.lt.u32.totalorder %s1241_s9, %s1373_s2 }
 0x43e   :  { %p1247_p13 = pnand %p1245_p12, %p1242_p11 }
 0x440   :  { %1250 = shalt.err (!%p1247_p13)
}
 0x441   :  { %s1265_s14 = smov [#allocation6]  }
 0x442   :  { %1038 = dma.smem_to_hbm %s1265_s14, 16, %s1373_s2, [#allocation7]  }
 0x443   :  { %1253 = dma.done.wait [#allocation4], 16  }
 0x444   :  { %1254 = vsyncadd [#allocation4], 4294967280 }
 0x445   :  { %1255 = dma.done.wait [#allocation7], 16  }
 0x446   :  { %1256 = vsyncadd [#allocation7], 4294967280 }
 0x447   :  { %1045 = sfence }
 0x448   :  { %1046 = vsyncpa [#allocation3], 1 }
 0x449   :  { %1047 = vsyncpa [#allocation4], 1 }
 0x44a   :  { %1048 = vsyncpa [#allocation7], 1 }

</bundles_post_ra>
